<compile_context>
chip_gen: v6e
topology: v6e:2x2x1
jax: 0.10.0
libtpu: 0.0.40
codegen_flags: <defaults>
</compile_context>

<pallas_src>
import math

import jax
import jax.numpy as jnp
from jax.experimental import pallas as pl
from jax.experimental.pallas import tpu as pltpu

_MIB = 1024 * 1024


def _flash_attention_kernel(x1_ref, k_ref, v_ref, mask_ref, wq_ref, o_ref,
                            q_scratch, m_scratch, l_scratch):
    """One (batch-tile, q-tile, k-tile) step of fused attention."""
    ki = pl.program_id(2)

    @pl.when(ki == 0)
    def _init():
        bt, tq, d1 = x1_ref.shape
        hp = wq_ref.shape[1]
        # Q projection (scale already folded into wq): bf16 MXU, f32 accum.
        q = jnp.dot(x1_ref[...].reshape(bt * tq, d1).astype(jnp.bfloat16),
                    wq_ref[...], preferred_element_type=jnp.float32)
        q_scratch[...] = q.astype(jnp.bfloat16).reshape(bt, tq, hp)
        m_scratch[...] = jnp.full(m_scratch.shape, -jnp.inf, m_scratch.dtype)
        l_scratch[...] = jnp.zeros(l_scratch.shape, l_scratch.dtype)
        o_ref[...] = jnp.zeros(o_ref.shape, o_ref.dtype)

    # Scores: contract the (padded) head dim directly -- no explicit k.T.
    s = jnp.einsum('bqh,bkh->bqk', q_scratch[...], k_ref[...],
                   preferred_element_type=jnp.float32)
    s = s + mask_ref[...].astype(jnp.float32)

    # Online softmax with deferred normalization; guarded against rows that
    # are fully masked (-inf) so far.
    m_prev = m_scratch[...]
    m_next = jnp.maximum(m_prev, jnp.max(s, axis=-1, keepdims=True))
    m_safe = jnp.where(m_next == -jnp.inf, 0.0, m_next)
    alpha = jnp.exp(m_prev - m_safe)            # exp(-inf) = 0 on first visit
    # TODO(synk): on v6e/v7x the exp could run in bf16 (2x EUP throughput);
    # kept f32 here for v5e portability.
    p = jnp.exp(s - m_safe)

    l_scratch[...] = alpha * l_scratch[...] + jnp.sum(p, axis=-1, keepdims=True)
    pv = jnp.einsum('bqk,bkh->bqh', p.astype(jnp.bfloat16), v_ref[...],
                    preferred_element_type=jnp.float32)
    # Accumulate straight into the resident f32 output block.
    o_ref[...] = alpha * o_ref[...] + pv
    m_scratch[...] = m_next

    @pl.when(ki == pl.num_programs(2) - 1)
    def _finalize():
        l = l_scratch[...]
        l_safe = jnp.where(l == 0.0, 1.0, l)    # fully-masked rows -> 0 output
        o_ref[...] = o_ref[...] * pl.reciprocal(l_safe, approx=True)


def _round_up(x, m):
    return ((x + m - 1) // m) * m


def _pick_vmem_limit_bytes():
    """Per-generation VMEM limit: leave headroom below physical capacity."""
    cap = None
    try:
        cap = getattr(pltpu.get_tpu_info(), "vmem_capacity_bytes", None)
    except Exception:
        cap = None
    if not cap:
        cap = 64 * _MIB                         # conservative: v7x physical VMEM
    # v7x (64 MiB) -> 52 MiB; v5e/v6e (128 MiB) -> 112 MiB.
    return int(max(32 * _MIB, min(cap - 12 * _MIB, 112 * _MIB)))


def _tile_candidates(dim, align, cap):
    """Aligned divisors of dim (plus the full dim), descending, capped."""
    cands = []
    if dim <= cap:
        cands.append(dim)                       # full dim is always legal
    t = (min(dim, cap) // align) * align
    while t >= align:
        if dim % t == 0:
            cands.append(t)
        t -= align
    if not cands:
        cands.append(dim)
    return sorted(set(cands), reverse=True)


def _est_vmem_bytes(bt, tq, tk, d1, hp, mask_isz):
    """Double-buffered blocks + resident weights + scratch for one grid step."""
    x1_b = bt * tq * d1 * 4
    k_b = bt * tk * hp * 2
    v_b = bt * tk * hp * 2
    mask_b = bt * tq * tk * mask_isz
    out_b = bt * tq * hp * 4
    w_b = d1 * hp * 2
    scratch = bt * tq * hp * 2 + 2 * bt * tq * 4
    return 2 * (x1_b + k_b + v_b + mask_b + out_b) + w_b + scratch


def _choose_tiles(Sq, Sk, d1, hp, mask_isz, budget):
    """Largest VMEM-fitting (tq, tk); big tk amortizes per-step overhead."""
    tq_cands = _tile_candidates(Sq, 8, 512)
    tk_cands = _tile_candidates(Sk, 128, 1024)
    for tk in tk_cands:
        for tq in tq_cands:
            if _est_vmem_bytes(1, tq, tk, d1, hp, mask_isz) <= budget:
                return tq, tk
    return tq_cands[-1], tk_cands[-1]


def _choose_bt(B, Sq, tq, tk, d1, hp, mask_isz, budget):
    """Fuse small batches per grid step (taller MXU M dim) while keeping at
    least 2 'parallel' grid steps so v7x megacore isn't left idle."""
    if tq != Sq or Sq >= 128 or Sq % 8 != 0:
        return 1
    best = 1
    for bt in range(2, min(B, max(1, 256 // Sq)) + 1):
        if B % bt:
            continue
        if B >= 2 and (B // bt) * (Sq // tq) < 2:
            continue
        if _est_vmem_bytes(bt, tq, tk, d1, hp, mask_isz) > budget:
            continue
        best = bt
    return best


def self_attention(x1, x2, x3, mask, wq, wk, wv, hidden_dim,
                   block_q=None, block_k=None, block_b=None):
    """Matches PyTorch SelfAttention.forward.

    x1:(B,Sq,D1) x2:(B,Sk,D2) x3:(B,Sk,D3) mask:(B,Sq,Sk) (any float dtype;
    pass bf16 to halve its HBM stream).  wq/wk/wv: nn.Linear weights (H, D*).
    Returns (B, Sq, H) float32.
    """
    B, Sq, D1 = x1.shape
    _, Sk, D2 = x2.shape
    _, _, D3 = x3.shape
    H = int(hidden_dim)
    Hp = _round_up(H, 128)            # lane-dense head dim (MXU N / store path)
    scale = 1.0 / math.sqrt(float(H))

    # bf16 weights (halved VMEM/HBM); fold 1/sqrt(H) into Wq; zero-pad H -> Hp.
    def prep(w, hp):
        wt = w.astype(jnp.float32).T                     # (D, H): x @ W.T == x @ wt
        if hp > w.shape[0]:
            wt = jnp.pad(wt, ((0, 0), (0, hp - w.shape[0])))
        return wt.astype(jnp.bfloat16)

    wq_t = prep(wq * jnp.float32(scale), Hp)
    wk_t = prep(wk, Hp)
    wv_t = prep(wv, Hp)

    # Prologue: precompute K/V once (bf16 in, f32 MXU accum, bf16 out) so the
    # attention kernel never redoes the K/V projections per q-tile.
    k_act = jnp.einsum('bsd,dh->bsh', x2.astype(jnp.bfloat16), wk_t,
                       preferred_element_type=jnp.float32).astype(jnp.bfloat16)
    v_act = jnp.einsum('bsd,dh->bsh', x3.astype(jnp.bfloat16), wv_t,
                       preferred_element_type=jnp.float32).astype(jnp.bfloat16)

    mask_isz = jnp.dtype(mask.dtype).itemsize

    vmem_limit = _pick_vmem_limit_bytes()
    budget = int(0.70 * vmem_limit)      # headroom for compiler internal scratch

    tq = block_q
    tk = block_k
    if tq is None or tk is None:
        auto_tq, auto_tk = _choose_tiles(Sq, Sk, D1, Hp, mask_isz, budget)
        tq = auto_tq if tq is None else tq
        tk = auto_tk if tk is None else tk
    bt = block_b if block_b is not None else _choose_bt(
        B, Sq, tq, tk, D1, Hp, mask_isz, budget)

    assert Sq % tq == 0, f"block_q={tq} must divide Sq={Sq}"
    assert Sk % tk == 0, f"block_k={tk} must divide Sk={Sk}"
    assert B % bt == 0, f"block_b={bt} must divide B={B}"

    grid = (B // bt, Sq // tq, Sk // tk)

    # Whole-array VMEM resident (constant across the grid, single-buffered).
    weight_spec = pl.BlockSpec(memory_space=pltpu.MemorySpace.VMEM)

    out_padded = pl.pallas_call(
        _flash_attention_kernel,
        out_shape=jax.ShapeDtypeStruct((B, Sq, Hp), jnp.float32),
        grid_spec=pltpu.PrefetchScalarGridSpec(
            num_scalar_prefetch=0,
            grid=grid,
            in_specs=[
                pl.BlockSpec((bt, tq, D1), lambda b, qi, ki: (b, qi, 0)),   # x1
                pl.BlockSpec((bt, tk, Hp), lambda b, qi, ki: (b, ki, 0)),   # K (bf16)
                pl.BlockSpec((bt, tk, Hp), lambda b, qi, ki: (b, ki, 0)),   # V (bf16)
                pl.BlockSpec((bt, tq, tk), lambda b, qi, ki: (b, qi, ki)),  # mask
                weight_spec,                                                # Wq^T (bf16)
            ],
            out_specs=pl.BlockSpec((bt, tq, Hp), lambda b, qi, ki: (b, qi, 0)),
            scratch_shapes=[
                pltpu.VMEM((bt, tq, Hp), jnp.bfloat16),   # projected + scaled Q
                pltpu.VMEM((bt, tq, 1), jnp.float32),     # running row max
                pltpu.VMEM((bt, tq, 1), jnp.float32),     # running row sum
            ],
        ),
        compiler_params=pltpu.CompilerParams(
            dimension_semantics=("parallel", "parallel", "arbitrary"),
            vmem_limit_bytes=vmem_limit,
        ),
    )(x1, k_act, v_act, mask, wq_t)

    return out_padded[..., :H] if Hp != H else out_padded


def _reference(x1, x2, x3, mask, wq, wk, wv, hidden_dim):
    q = x1 @ wq.T
    k = x2 @ wk.T
    v = x3 @ wv.T
    scores = (q @ jnp.swapaxes(k, -2, -1)) / jnp.sqrt(jnp.float32(hidden_dim))
    w = jax.nn.softmax(scores + mask, axis=-1)
    return w @ v


if __name__ == "__main__":
    B, Sq, Sk = 2, 8, 8
    D1, D2, D3 = 16, 16, 16
    H = 32

    key = jax.random.PRNGKey(0)
    k1, k2, k3, k4, k5, k6, k7 = jax.random.split(key, 7)

    x1 = jax.random.normal(k1, (B, Sq, D1), dtype=jnp.float32)
    x2 = jax.random.normal(k2, (B, Sk, D2), dtype=jnp.float32)
    x3 = jax.random.normal(k3, (B, Sk, D3), dtype=jnp.float32)
    mask = jax.random.normal(k4, (B, Sq, Sk), dtype=jnp.float32) * 0.1

    # nn.Linear(in, out, bias=False) weights: shape (out, in).
    def linear_init(k, out_dim, in_dim):
        bound = 1.0 / jnp.sqrt(jnp.float32(in_dim))
        return jax.random.uniform(k, (out_dim, in_dim), jnp.float32, -bound, bound)

    wq = linear_init(k5, H, D1)
    wk = linear_init(k6, H, D2)
    wv = linear_init(k7, H, D3)

    # Stream the additive mask in bf16 (halves its per-k-step HBM traffic).
    out = self_attention(x1, x2, x3, mask.astype(jnp.bfloat16), wq, wk, wv, H)
    out = jax.block_until_ready(out)

    ref = _reference(x1, x2, x3, mask, wq, wk, wv, H)
    assert out.shape == (B, Sq, H)
    # Tolerance loosened vs. pure-f32: bf16 matmul inputs, bf16 mask stream,
    # approx reciprocal.
    assert jnp.allclose(out, ref, atol=2e-2, rtol=2e-2), "mismatch vs reference"

    print("KERNEL_OK")
</pallas_src>

<mosaic_0001>
module attributes {stable_mosaic.version = 11 : i64} {
  func.func @_flash_attention_kernel(%arg0: i32, %arg1: i32, %arg2: i32, %arg3: memref<1x8x16xf32, #tpu.memory_space<vmem>>, %arg4: memref<1x8x128xbf16, #tpu.memory_space<vmem>>, %arg5: memref<1x8x128xbf16, #tpu.memory_space<vmem>>, %arg6: memref<1x8x8xbf16, #tpu.memory_space<vmem>>, %arg7: memref<16x128xbf16, #tpu.memory_space<vmem>>, %arg8: memref<1x8x128xf32, #tpu.memory_space<vmem>>, %arg9: memref<1x8x128xbf16, #tpu.memory_space<vmem>>, %arg10: memref<1x8x1xf32, #tpu.memory_space<vmem>>, %arg11: memref<1x8x1xf32, #tpu.memory_space<vmem>>) attributes {dimension_semantics = [#tpu.dimension_semantics<parallel>, #tpu.dimension_semantics<parallel>, #tpu.dimension_semantics<arbitrary>], iteration_bounds = array<i64: 2, 1, 1>, scalar_prefetch = 0 : i64, scratch_operands = 3 : i64, tpu.core_type = #tpu.core_type<tc>, window_params = [{transform_indices = @transform_0, window_bounds = array<i64: 1, 8, 16>}, {transform_indices = @transform_1, window_bounds = array<i64: 1, 8, 128>}, {transform_indices = @transform_2, window_bounds = array<i64: 1, 8, 128>}, {transform_indices = @transform_3, window_bounds = array<i64: 1, 8, 8>}, {pipeline_mode = #tpu.pipeline_mode<synchronous>, transform_indices = @transform_4, window_bounds = array<i64: 16, 128>}, {transform_indices = @transform_5, window_bounds = array<i64: 1, 8, 128>}]} {
    %c0_i32 = arith.constant 0 : i32
    %0 = arith.cmpi eq, %arg2, %c0_i32 : i32
    %1 = arith.extui %0 : i1 to i32
    %c0_i32_0 = arith.constant 0 : i32
    %2 = arith.cmpi ne, %1, %c0_i32_0 : i32
    scf.if %2 {
      %c0_37 = arith.constant 0 : index
      %c0_38 = arith.constant 0 : index
      %c0_39 = arith.constant 0 : index
      %40 = vector.load %arg3[%c0_37, %c0_38, %c0_39] : memref<1x8x16xf32, #tpu.memory_space<vmem>>, vector<1x8x16xf32>
      %41 = vector.shape_cast %40 : vector<1x8x16xf32> to vector<8x16xf32>
      %42 = arith.truncf %41 : vector<8x16xf32> to vector<8x16xbf16>
      %c0_40 = arith.constant 0 : index
      %c0_41 = arith.constant 0 : index
      %43 = vector.load %arg7[%c0_40, %c0_41] : memref<16x128xbf16, #tpu.memory_space<vmem>>, vector<16x128xbf16>
      %cst_42 = arith.constant dense<0.000000e+00> : vector<8x128xf32>
      %44 = tpu.matmul %42, %43, %cst_42 {dimension_numbers = #tpu.dot_dimension_numbers<[1], [0], [0], [1], [0, 0, 1, 1], [], []>} : vector<8x16xbf16>, vector<16x128xbf16>, vector<8x128xf32> -> vector<8x128xf32>
      %45 = arith.truncf %44 : vector<8x128xf32> to vector<8x128xbf16>
      %46 = vector.shape_cast %45 : vector<8x128xbf16> to vector<1x8x128xbf16>
      %c0_43 = arith.constant 0 : index
      %c0_44 = arith.constant 0 : index
      %c0_45 = arith.constant 0 : index
      %47 = vector.load %arg9[%c0_43, %c0_44, %c0_45] : memref<1x8x128xbf16, #tpu.memory_space<vmem>>, vector<1x8x128xbf16>
      tpu.vector_store %arg9[%c0_43, %c0_44, %c0_45], %46 {strides = array<i32>} : memref<1x8x128xbf16, #tpu.memory_space<vmem>>, vector<1x8x128xbf16>,
      %cst_46 = arith.constant 0xFF800000 : f32
      %48 = vector.broadcast %cst_46 : f32 to vector<1x8x1xf32>
      %c0_47 = arith.constant 0 : index
      %c0_48 = arith.constant 0 : index
      %c0_49 = arith.constant 0 : index
      %49 = vector.load %arg10[%c0_47, %c0_48, %c0_49] : memref<1x8x1xf32, #tpu.memory_space<vmem>>, vector<1x8x1xf32>
      tpu.vector_store %arg10[%c0_47, %c0_48, %c0_49], %48 {strides = array<i32>} : memref<1x8x1xf32, #tpu.memory_space<vmem>>, vector<1x8x1xf32>,
      %cst_50 = arith.constant 0.000000e+00 : f32
      %50 = vector.broadcast %cst_50 : f32 to vector<1x8x1xf32>
      %c0_51 = arith.constant 0 : index
      %c0_52 = arith.constant 0 : index
      %c0_53 = arith.constant 0 : index
      %51 = vector.load %arg11[%c0_51, %c0_52, %c0_53] : memref<1x8x1xf32, #tpu.memory_space<vmem>>, vector<1x8x1xf32>
      tpu.vector_store %arg11[%c0_51, %c0_52, %c0_53], %50 {strides = array<i32>} : memref<1x8x1xf32, #tpu.memory_space<vmem>>, vector<1x8x1xf32>,
      %cst_54 = arith.constant 0.000000e+00 : f32
      %52 = vector.broadcast %cst_54 : f32 to vector<1x8x128xf32>
      %c0_55 = arith.constant 0 : index
      %c0_56 = arith.constant 0 : index
      %c0_57 = arith.constant 0 : index
      %53 = vector.load %arg8[%c0_55, %c0_56, %c0_57] : memref<1x8x128xf32, #tpu.memory_space<vmem>>, vector<1x8x128xf32>
      tpu.vector_store %arg8[%c0_55, %c0_56, %c0_57], %52 {strides = array<i32>} : memref<1x8x128xf32, #tpu.memory_space<vmem>>, vector<1x8x128xf32>,
    } else {
    }
    %c0 = arith.constant 0 : index
    %c0_1 = arith.constant 0 : index
    %c0_2 = arith.constant 0 : index
    %3 = vector.load %arg9[%c0, %c0_1, %c0_2] : memref<1x8x128xbf16, #tpu.memory_space<vmem>>, vector<1x8x128xbf16>
    %c0_3 = arith.constant 0 : index
    %c0_4 = arith.constant 0 : index
    %c0_5 = arith.constant 0 : index
    %4 = vector.load %arg4[%c0_3, %c0_4, %c0_5] : memref<1x8x128xbf16, #tpu.memory_space<vmem>>, vector<1x8x128xbf16>
    "tpu.trace_start"() <{level = 10 : i32, message = "bqh,bkh->bqk"}> : () -> ()
    %cst = arith.constant dense<0.000000e+00> : vector<1x8x8xf32>
    %5 = tpu.matmul %3, %4, %cst {dimension_numbers = #tpu.dot_dimension_numbers<[2], [2], [1], [1], [0, 0, 0, 1, 1, 1], [0], [0]>} : vector<1x8x128xbf16>, vector<1x8x128xbf16>, vector<1x8x8xf32> -> vector<1x8x8xf32>
    "tpu.trace_stop"() : () -> ()
    %c0_6 = arith.constant 0 : index
    %c0_7 = arith.constant 0 : index
    %c0_8 = arith.constant 0 : index
    %6 = vector.load %arg6[%c0_6, %c0_7, %c0_8] : memref<1x8x8xbf16, #tpu.memory_space<vmem>>, vector<1x8x8xbf16>
    %7 = arith.extf %6 : vector<1x8x8xbf16> to vector<1x8x8xf32>
    %8 = arith.addf %5, %7 : vector<1x8x8xf32>
    %c0_9 = arith.constant 0 : index
    %c0_10 = arith.constant 0 : index
    %c0_11 = arith.constant 0 : index
    %9 = vector.load %arg10[%c0_9, %c0_10, %c0_11] : memref<1x8x1xf32, #tpu.memory_space<vmem>>, vector<1x8x1xf32>
    %cst_12 = arith.constant dense<0xFF800000> : vector<1x8xf32>
    %10 = vector.multi_reduction <maximumf>, %8, %cst_12 [2] : vector<1x8x8xf32> to vector<1x8xf32>
    %11 = vector.shape_cast %10 : vector<1x8xf32> to vector<1x8x1xf32>
    %12 = arith.maximumf %9, %11 : vector<1x8x1xf32>
    %cst_13 = arith.constant 0xFF800000 : f32
    %13 = vector.broadcast %cst_13 : f32 to vector<1x8x1xf32>
    %14 = arith.cmpf oeq, %12, %13 : vector<1x8x1xf32>
    %cst_14 = arith.constant 0.000000e+00 : f32
    %15 = vector.broadcast %cst_14 : f32 to vector<1x8x1xf32>
    %16 = arith.select %14, %15, %12 : vector<1x8x1xi1>, vector<1x8x1xf32>
    %17 = arith.subf %9, %16 : vector<1x8x1xf32>
    %18 = math.exp %17 : vector<1x8x1xf32>
    %19 = vector.broadcast %16 : vector<1x8x1xf32> to vector<1x8x8xf32>
    %20 = arith.subf %8, %19 : vector<1x8x8xf32>
    %21 = math.exp %20 : vector<1x8x8xf32>
    %c0_15 = arith.constant 0 : index
    %c0_16 = arith.constant 0 : index
    %c0_17 = arith.constant 0 : index
    %22 = vector.load %arg11[%c0_15, %c0_16, %c0_17] : memref<1x8x1xf32, #tpu.memory_space<vmem>>, vector<1x8x1xf32>
    %23 = arith.mulf %18, %22 : vector<1x8x1xf32>
    %cst_18 = arith.constant dense<0.000000e+00> : vector<1x8xf32>
    %24 = vector.multi_reduction <add>, %21, %cst_18 [2] : vector<1x8x8xf32> to vector<1x8xf32>
    %25 = vector.shape_cast %24 : vector<1x8xf32> to vector<1x8x1xf32>
    %26 = arith.addf %23, %25 : vector<1x8x1xf32>
    %c0_19 = arith.constant 0 : index
    %c0_20 = arith.constant 0 : index
    %c0_21 = arith.constant 0 : index
    %27 = vector.load %arg11[%c0_19, %c0_20, %c0_21] : memref<1x8x1xf32, #tpu.memory_space<vmem>>, vector<1x8x1xf32>
    tpu.vector_store %arg11[%c0_19, %c0_20, %c0_21], %26 {strides = array<i32>} : memref<1x8x1xf32, #tpu.memory_space<vmem>>, vector<1x8x1xf32>,
    %28 = arith.truncf %21 : vector<1x8x8xf32> to vector<1x8x8xbf16>
    %c0_22 = arith.constant 0 : index
    %c0_23 = arith.constant 0 : index
    %c0_24 = arith.constant 0 : index
    %29 = vector.load %arg5[%c0_22, %c0_23, %c0_24] : memref<1x8x128xbf16, #tpu.memory_space<vmem>>, vector<1x8x128xbf16>
    "tpu.trace_start"() <{level = 10 : i32, message = "bqk,bkh->bqh"}> : () -> ()
    %cst_25 = arith.constant dense<0.000000e+00> : vector<1x8x128xf32>
    %30 = tpu.matmul %28, %29, %cst_25 {dimension_numbers = #tpu.dot_dimension_numbers<[2], [1], [1], [2], [0, 0, 0, 1, 1, 2], [0], [0]>} : vector<1x8x8xbf16>, vector<1x8x128xbf16>, vector<1x8x128xf32> -> vector<1x8x128xf32>
    "tpu.trace_stop"() : () -> ()
    %c0_26 = arith.constant 0 : index
    %c0_27 = arith.constant 0 : index
    %c0_28 = arith.constant 0 : index
    %31 = vector.load %arg8[%c0_26, %c0_27, %c0_28] : memref<1x8x128xf32, #tpu.memory_space<vmem>>, vector<1x8x128xf32>
    %32 = vector.broadcast %18 : vector<1x8x1xf32> to vector<1x8x128xf32>
    %33 = arith.mulf %32, %31 : vector<1x8x128xf32>
    %34 = arith.addf %33, %30 : vector<1x8x128xf32>
    %c0_29 = arith.constant 0 : index
    %c0_30 = arith.constant 0 : index
    %c0_31 = arith.constant 0 : index
    %35 = vector.load %arg8[%c0_29, %c0_30, %c0_31] : memref<1x8x128xf32, #tpu.memory_space<vmem>>, vector<1x8x128xf32>
    tpu.vector_store %arg8[%c0_29, %c0_30, %c0_31], %34 {strides = array<i32>} : memref<1x8x128xf32, #tpu.memory_space<vmem>>, vector<1x8x128xf32>,
    %c0_32 = arith.constant 0 : index
    %c0_33 = arith.constant 0 : index
    %c0_34 = arith.constant 0 : index
    %36 = vector.load %arg10[%c0_32, %c0_33, %c0_34] : memref<1x8x1xf32, #tpu.memory_space<vmem>>, vector<1x8x1xf32>
    tpu.vector_store %arg10[%c0_32, %c0_33, %c0_34], %12 {strides = array<i32>} : memref<1x8x1xf32, #tpu.memory_space<vmem>>, vector<1x8x1xf32>,
    %c0_i32_35 = arith.constant 0 : i32
    %37 = arith.cmpi eq, %arg2, %c0_i32_35 : i32
    %38 = arith.extui %37 : i1 to i32
    %c0_i32_36 = arith.constant 0 : i32
    %39 = arith.cmpi ne, %38, %c0_i32_36 : i32
    scf.if %39 {
      %c0_37 = arith.constant 0 : index
      %c0_38 = arith.constant 0 : index
      %c0_39 = arith.constant 0 : index
      %40 = vector.load %arg11[%c0_37, %c0_38, %c0_39] : memref<1x8x1xf32, #tpu.memory_space<vmem>>, vector<1x8x1xf32>
      %cst_40 = arith.constant 0.000000e+00 : f32
      %41 = vector.broadcast %cst_40 : f32 to vector<1x8x1xf32>
      %42 = arith.cmpf oeq, %40, %41 : vector<1x8x1xf32>
      %cst_41 = arith.constant 1.000000e+00 : f32
      %43 = vector.broadcast %cst_41 : f32 to vector<1x8x1xf32>
      %44 = arith.select %42, %43, %40 : vector<1x8x1xi1>, vector<1x8x1xf32>
      %c0_42 = arith.constant 0 : index
      %c0_43 = arith.constant 0 : index
      %c0_44 = arith.constant 0 : index
      %45 = vector.load %arg8[%c0_42, %c0_43, %c0_44] : memref<1x8x128xf32, #tpu.memory_space<vmem>>, vector<1x8x128xf32>
      %46 = tpu.reciprocal %44 {approx = true} : vector<1x8x1xf32> -> vector<1x8x1xf32>
      %47 = vector.broadcast %46 : vector<1x8x1xf32> to vector<1x8x128xf32>
      %48 = arith.mulf %45, %47 : vector<1x8x128xf32>
      %c0_45 = arith.constant 0 : index
      %c0_46 = arith.constant 0 : index
      %c0_47 = arith.constant 0 : index
      %49 = vector.load %arg8[%c0_45, %c0_46, %c0_47] : memref<1x8x128xf32, #tpu.memory_space<vmem>>, vector<1x8x128xf32>
      tpu.vector_store %arg8[%c0_45, %c0_46, %c0_47], %48 {strides = array<i32>} : memref<1x8x128xf32, #tpu.memory_space<vmem>>, vector<1x8x128xf32>,
    } else {
    }
    return
  }
  func.func @transform_0(%arg0: i32, %arg1: i32, %arg2: i32) -> (i32, i32, i32) {
    %c0_i32 = arith.constant 0 : i32
    %c0_i32_0 = arith.constant 0 : i32
    return %arg0, %arg1, %c0_i32 : i32, i32, i32
  }
  func.func @transform_1(%arg0: i32, %arg1: i32, %arg2: i32) -> (i32, i32, i32) {
    %c0_i32 = arith.constant 0 : i32
    %c0_i32_0 = arith.constant 0 : i32
    return %arg0, %arg2, %c0_i32 : i32, i32, i32
  }
  func.func @transform_2(%arg0: i32, %arg1: i32, %arg2: i32) -> (i32, i32, i32) {
    %c0_i32 = arith.constant 0 : i32
    %c0_i32_0 = arith.constant 0 : i32
    return %arg0, %arg2, %c0_i32 : i32, i32, i32
  }
  func.func @transform_3(%arg0: i32, %arg1: i32, %arg2: i32) -> (i32, i32, i32) {
    %c0_i32 = arith.constant 0 : i32
    return %arg0, %arg1, %arg2 : i32, i32, i32
  }
  func.func @transform_4(%arg0: i32, %arg1: i32, %arg2: i32) -> (i32, i32) {
    %c0_i32 = arith.constant 0 : i32
    %c0_i32_0 = arith.constant 0 : i32
    %c0_i32_1 = arith.constant 0 : i32
    return %c0_i32, %c0_i32_0 : i32, i32
  }
  func.func @transform_5(%arg0: i32, %arg1: i32, %arg2: i32) -> (i32, i32, i32) {
    %c0_i32 = arith.constant 0 : i32
    %c0_i32_0 = arith.constant 0 : i32
    return %arg0, %arg1, %c0_i32 : i32, i32, i32
  }
}

</mosaic_0001>

<bundles_post_ra>
// kernel: tpu_custom_call.1
= control target key start
LH: loop header
LB: loop body
LE: loop exit
PB: predicated region body
PF: predicated region fallthrough
CT: control target
= control target key end

     0   :  { %s1462_s0 = inlined_call_operand.hbm [shape: f32[2,8,16], index: 0, kind: input, shape index: {}]   ;;  %s1463_s1 = inlined_call_operand.hbm [shape: bf16[2,8,128], index: 1, kind: input, shape index: {}]   ;;  %s1464_s2 = inlined_call_operand.hbm [shape: bf16[2,8,128], index: 2, kind: input, shape index: {}]   ;;  %s1465_s3 = inlined_call_operand.hbm [shape: bf16[2,8,8], index: 3, kind: input, shape index: {}]   ;;  %s1466_s4 = inlined_call_operand.hbm [shape: bf16[16,128], index: 4, kind: input, shape index: {}]   ;;  %s1467_s5 = inlined_call_operand.hbm [shape: f32[2,8,128], index: 5, kind: output, shape index: {}]  }
   0x1   :  { %1474 = sst [smem:[#allocation26_spill]] %s1463_s1 }
   0x2   :  { %1475 = sst [smem:[#allocation27_spill]] %s1466_s4 }
   0x3   :  { %10 = vsyncpa [#allocation6], 0 }
   0x4   :  { %12 = vsyncpa [#allocation6 + $0x1], 0 }
   0x5   :  { %13 = vsyncpa [#allocation9], 0 }
   0x6   :  { %15 = vsyncpa [#allocation9 + $0x1], 0 }
   0x7   :  { %16 = vsyncpa [#allocation12], 0 }
   0x8   :  { %18 = vsyncpa [#allocation12 + $0x1], 0 }
   0x9   :  { %19 = vsyncpa [#allocation7], 0 }
   0xa   :  { %21 = vsyncpa [#allocation7 + $0x1], 0  ;;  %s1213_s18 = smov 0   ;;  %s1215_s19 = smov 0  }
   0xb   :  { %s1217_s20 = smov 0   ;;  %s1219_s21 = smov 0  }
   0xc   :  { %s1221_s22 = smov 0   ;;  %s1223_s23 = smov 0  }
   0xd LB: > { %1476 = sst [smem:[#allocation20_spill]] %s1149_s18  ;;  %s1244_s24 = sadd.s32 4294967295, %s1169_s23   ;;  %s1169_s23 = sphi %s1223_s23, %s27_s23   ;;  %s1165_s22 = sphi %s1221_s22, %s1498_s22   ;;  %s1161_s21 = sphi %s1219_s21, %s1497_s21   ;;  %s1157_s20 = sphi %s1217_s20, %s1496_s20   ;;  %s1153_s19 = sphi %s1215_s19, %s1500_s19   ;;  %s1149_s18 = sphi %s1213_s18, %s1499_s18  }
   0xe   : > { %1477 = sst [smem:[#allocation21_spill]] %s1157_s20  ;;  %s786_s25 = sadd.s32 4294967294, %s1169_s23  }
   0xf   : > { %1478 = sst [smem:[#allocation22_spill]] %s1165_s22  ;;  %p68_p0 = scmp.ne.s32.totalorder %s1153_s19, %s1149_s18 }
  0x10   : > { %p69_p1 = scmp.eq.s32.totalorder %s1244_s24, 0  ;;  %p207_p3 = scmp.eq.s32.totalorder %s786_s25, 1 }
  0x11   : > { %p787_p5 = scmp.ge.s32.totalorder %s1169_s23, 1  ;;  %p214_p7 = scmp.lt.s32.totalorder %s1169_s23, 3 }
  0x12   : > { %p1253_p4 = por %p69_p1, %p68_p0  ;;  %p1258_p6 = por %p207_p3, %p68_p0 }
  0x13   : > { %p1263_p8 = pnand %p787_p5, %p214_p7  ;;  %s1171_s29 = smov [#allocation13]  }
  0x14   : > { %s1480_s27 = scalar_select %p1258_p6, 1, 0 }
  0x15   : > { %s226_s30 = sshll.u32 %s1171_s29, 4  ;;  %p850_p9 = pneg %p1263_p8  ;;  %s227_s30 = int_to_ptr.vmem [resolvable:$true] %s226_s30 }
  0x16   : > { %1481 = sst [smem:[#allocation23_spill]] %s1480_s27  ;;  %p789_p10 = scmp.ge.s32.totalorder %s1169_s23, 2 }
  0x17   : > { %p1272_p11 = pnand %p850_p9, %p69_p1  ;;  %s46_s7 = sadd.s32 1, %s1165_s22 }
  0x18   : > { %s950_s8 = scalar_lea.vmem %s227_s30, 128  ;;  %p958_p5 = scmp.lt.s32.totalorder %s227_s30, %s227_s30 }
  0x19   : > { %p941_p12 = pneg %p1272_p11  ;;  %p951_p13 = scmp.ne.s32.totalorder %s227_s30, %s950_s8 }
  0x1a   : > { %p959_p7 = scmp.lt.s32.totalorder %s950_s8, %s950_s8 }
  0x1b   : > { %p953_p0 = pnand %p951_p13, %p941_p12 }
  0x1c   : > { %p960_p2 = por %p959_p7, %p958_p5 }
  0x1d   : > { %p954_p3 = pneg %p953_p0 }
  0x1f   : > { %p961_p6 = pnand %p960_p2, %p954_p3 }
  0x21   : > { %964 = shalt.err (!%p961_p6)
}
  0x22   : > { %s1172_s9 = smov 64   ;;  %s1173_s10 = smov 4  }
  0x23   : > { %s1484_s4 = sld [smem:[#allocation27_spill]]  ;;  %p48_p2 = scmp.ge.s32.totalorder %s46_s7, 2 }
  0x24   : > { %s55_s13 = sadd.s32 1, %s1157_s20  ;;  %p62_p6 = scmp.ne.s32.totalorder %s1157_s20, %s1153_s19 }
  0x25   : > { %p63_p9 = scmp.eq.s32.totalorder %s1169_s23, 0  ;;  %s1502_s7 = smov (%p48_p2, %s46_s7), 0 }
  0x26   : > { %1485 = sst [smem:[#allocation24_spill]] %s1502_s7  ;;  %p1486_p13 = scmp.eq.s32.totalorder %s1244_s24, 1 }
  0x27   : > { %p64_p12 = por %p63_p9, %p62_p6  ;;  %s50_s15 = ssub.s32 %s1165_s22, %s1502_s7 }
  0x28   : > { %p1292_p0 = por %p1486_p13, %p62_p6  ;;  %p872_p3 = scmp.lt.s32.totalorder %s1169_s23, 2 }
  0x29   : > { %853 = dma.hbm_to_vmem [thread:$0]  (!%p1272_p11), %s1484_s4, 128, %s227_s30, [#allocation12], %s1172_s9, %s1172_s9, %s1173_s10  }
  0x2a   : > { %p53_p5 = scmp.eq.s32.totalorder %s50_s15, 0  ;;  %s1300_s16 = sand.u32 1, %s1157_s20  }
  0x2b   : > { %p1302_p11 = pnand %p872_p3, %p64_p12  ;;  %s1469_s25 = sand.u32 1, %s1169_s23  }
  0x2c   : > { %s1308_s29 = scalar_select %p53_p5, %s1157_s20, %s55_s13  }
  0x2d   : > { %s1311_s30 = sshll.u32 %s1300_s16, 2  ;;  %s1314_s6 = sshll.u32 %s1165_s22, 6 }
  0x2e   : > { %1489 = sst [smem:[#allocation25_spill]] %s1308_s29  ;;  %s263_s11 = scalar_lea.vmem [#allocation8], %s1311_s30 }
  0x2f   : > { %s1490_s1 = sld [smem:[#allocation26_spill]]  ;;  %s271_s12 = sshll.u32 %s263_s11, 4  ;;  %s272_s12 = int_to_ptr.vmem [resolvable:$true] %s271_s12 }
  0x30   : > { %s1323_s15 = scalar_lea.sflag [#allocation9], %s1469_s25  ;;  %p967_p7 = pneg %p1302_p11 }
  0x31   : > { %s978_s13 = scalar_lea.vmem %s272_s12, 64  ;;  %s1174_s4 = smov [#allocation8]  }
  0x32   : > { %p979_p2 = scmp.ne.s32.totalorder %s272_s12, %s978_s13  ;;  %s983_s7 = sshll.u32 %s1174_s4, 4  ;;  %s984_s7 = int_to_ptr.vmem [resolvable:$false] %s983_s7 }
  0x33   : > { %s985_s29 = scalar_lea.vmem %s984_s7, 128  ;;  %p986_p12 = scmp.lt.s32.totalorder %s272_s12, %s984_s7 }
  0x34   : > { %p981_p6 = pnand %p979_p2, %p967_p7  ;;  %p987_p13 = scmp.lt.s32.totalorder %s985_s29, %s978_s13 }
  0x35   : > { %s269_s10 = scalar_lea.hbm %s1490_s1, %s1314_s6 }
  0x36   : > { %p982_p9 = pneg %p981_p6  ;;  %p988_p3 = por %p987_p13, %p986_p12 }
  0x38   : > { %p989_p5 = pnand %p988_p3, %p982_p9 }
  0x3a   : > { %992 = shalt.err (!%p989_p5)
}
  0x3b   : > { %860 = dma.hbm_to_vmem [thread:$0]  (!%p1302_p11), %s269_s10, 64, %s272_s12, %s1323_s15  }
  0x3c   : > { %s790_s8 = sshll.u32 %s1300_s16, 3  ;;  %s791_s9 = sshll.u32 %s1165_s22, 7 }
  0x3d   : > { %s250_s25 = scalar_lea.hbm %s1462_s0, %s791_s9  ;;  %s244_s7 = scalar_lea.vmem [#allocation5], %s790_s8 }
  0x3e   : > { %s252_s29 = sshll.u32 %s244_s7, 4  ;;  %s288_s20 = scalar_lea.hbm %s1464_s2, %s1314_s6  ;;  %s253_s29 = int_to_ptr.vmem [resolvable:$true] %s252_s29 }
  0x3f   : > { %s241_s27 = scalar_lea.sflag [#allocation6], %s1300_s16  ;;  %s1006_s18 = scalar_lea.vmem %s253_s29, 128 }
  0x40   : > { %p1007_p2 = scmp.ne.s32.totalorder %s253_s29, %s1006_s18  ;;  %s1175_s10 = smov [#allocation5]  }
  0x41   : > { %s1011_s12 = sshll.u32 %s1175_s10, 4  ;;  %s1012_s12 = int_to_ptr.vmem [resolvable:$false] %s1011_s12 }
  0x42   : > { %p1009_p6 = pnand %p1007_p2, %p967_p7  ;;  %s1013_s22 = scalar_lea.vmem %s1012_s12, 256 }
  0x43   : > { %p1014_p12 = scmp.lt.s32.totalorder %s253_s29, %s1012_s12  ;;  %p1015_p13 = scmp.lt.s32.totalorder %s1013_s22, %s1006_s18 }
  0x44   : > { %p1010_p9 = pneg %p1009_p6 }
  0x45   : > { %p1016_p3 = por %p1015_p13, %p1014_p12 }
  0x47   : > { %p1017_p5 = pnand %p1016_p3, %p1010_p9 }
  0x49   : > { %1020 = shalt.err (!%p1017_p5)
}
  0x4a   : > { %857 = dma.hbm_to_vmem [thread:$0]  (!%p1302_p11), %s250_s25, 128, %s253_s29, %s241_s27  }
  0x4b   : > { %s282_s1 = scalar_lea.vmem [#allocation10], %s1311_s30  ;;  %s308_s11 = scalar_lea.hbm %s1465_s3, %s1314_s6 }
  0x4c   : > { %s290_s16 = sshll.u32 %s282_s1, 4  ;;  %s1176_s18 = smov [#allocation10]   ;;  %s291_s16 = int_to_ptr.vmem [resolvable:$true] %s290_s16 }
  0x4d   : > { %s1034_s4 = scalar_lea.vmem %s291_s16, 64  ;;  %s1039_s22 = sshll.u32 %s1176_s18, 4  ;;  %s1040_s22 = int_to_ptr.vmem [resolvable:$false] %s1039_s22 }
  0x4e   : > { %p1035_p2 = scmp.ne.s32.totalorder %s291_s16, %s1034_s4  ;;  %s1041_s7 = scalar_lea.vmem %s1040_s22, 128 }
  0x4f   : > { %p1042_p12 = scmp.lt.s32.totalorder %s291_s16, %s1040_s22  ;;  %p1043_p13 = scmp.lt.s32.totalorder %s1041_s7, %s1034_s4 }
  0x50   : > { %p1037_p6 = pnand %p1035_p2, %p967_p7 }
  0x51   : > { %p1044_p3 = por %p1043_p13, %p1042_p12 }
  0x52   : > { %p1038_p9 = pneg %p1037_p6 }
  0x54   : > { %p1045_p5 = pnand %p1044_p3, %p1038_p9 }
  0x56   : > { %1048 = shalt.err (!%p1045_p5)
}
  0x57   : > { %863 = dma.hbm_to_vmem [thread:$0]  (!%p1302_p11), %s288_s20, 64, %s291_s16, %s1323_s15  }
  0x58   : > { %s301_s29 = scalar_lea.vmem [#allocation11], %s1311_s30  ;;  %s1491_s10 = sand.u32 1, %s1169_s23  }
  0x59   : > { %s310_s13 = sshll.u32 %s301_s29, 4  ;;  %s298_s12 = scalar_lea.sflag [#allocation12], %s1491_s10  ;;  %s311_s13 = int_to_ptr.vmem [resolvable:$true] %s310_s13 }
  0x5a   : > { %s1062_s1 = scalar_lea.vmem %s311_s13, 64  ;;  %s1177_s8 = smov [#allocation11]  }
  0x5b   : > { %p1063_p2 = scmp.ne.s32.totalorder %s311_s13, %s1062_s1  ;;  %s1067_s9 = sshll.u32 %s1177_s8, 4  ;;  %s1068_s9 = int_to_ptr.vmem [resolvable:$false] %s1067_s9 }
  0x5c   : > { %s1069_s4 = scalar_lea.vmem %s1068_s9, 128  ;;  %p1070_p12 = scmp.lt.s32.totalorder %s311_s13, %s1068_s9 }
  0x5d   : > { %p1065_p6 = pnand %p1063_p2, %p967_p7  ;;  %p1071_p13 = scmp.lt.s32.totalorder %s1069_s4, %s1062_s1 }
  0x5f   : > { %p1066_p9 = pneg %p1065_p6  ;;  %p1072_p3 = por %p1071_p13, %p1070_p12 }
  0x61   : > { %p1073_p5 = pnand %p1072_p3, %p1066_p9 }
  0x63   : > { %1076 = shalt.err (!%p1073_p5)
}
  0x64   : > { %866 = dma.hbm_to_vmem [thread:$0]  (!%p1302_p11), %s308_s11, 64, %s311_s13, %s298_s12  }
  0x65   : > { %319 = sbr.rel (%p1263_p8) target bundleno = 1108 (0x454), region = 40  ;;  %s1380_s15 = sand.u32 (!%p1263_p8), 1, %s1153_s19  }
  0x66   : > { %s799_s16 = sshll.u32 (!%p1263_p8), %s1380_s15, 3  ;;  %s322_s18 = scalar_lea.sflag (!%p1263_p8), [#allocation6], %s1380_s15 }
  0x67   : > { %s325_s17 = scalar_lea.vmem (!%p1263_p8), [#allocation5], %s799_s16 }
  0x6a   : > { %1128 = dma.done.wait (%p1253_p4), %s322_s18, 128  }
  0x6b   : > { %1130 = vsyncadd (%p1253_p4), %s322_s18, 4294967168  ;;  %s330_s28 = sand.u32 1, %s1244_s24   ;;  %s1392_s6 = sshll.u32 %s1380_s15, 2 }
  0x6c   : > { %s331_s11 = scalar_lea.sflag [#allocation9], %s330_s28  ;;  %s334_s22 = scalar_lea.vmem [#allocation8], %s1392_s6 }
  0x6d   : > { %1132 = dma.done.wait (%p1253_p4), %s331_s11, 128  }
  0x6e   : > { %1134 = vsyncadd (%p1253_p4), %s331_s11, 4294967168  ;;  %s343_s7 = scalar_lea.vmem [#allocation10], %s1392_s6  ;;  %s349_s27 = scalar_lea.sflag [#allocation12], %s330_s28 }
  0x6f   : > { %s352_s25 = scalar_lea.vmem [#allocation11], %s1392_s6 }
  0x70   : > { %1136 = dma.done.wait (%p1253_p4), %s349_s27, 64  }
  0x71   : > { %1138 = vsyncadd (%p1253_p4), %s349_s27, 4294967232 }
  0x72   : > { %1140 = dma.done.wait (%p69_p1), [#allocation12], 128  }
  0x73   : > { %1142 = vsyncadd (%p69_p1), [#allocation12], 4294967168  ;;  %v1178_v0 = vmov 0.0   ;;  %vm1179_vm0 = vmmov 0   ;;  %v932_v1 = vld [vmem:[#allocation13] sm:$0xff]   ;;  %vm413_vm1 = vcmask 130048  }
  0x74   : > { %818 = vmatprep.subr.bf16.mxu0 %v1178_v0  ;;  %820 = vmatprep.mubr.msk.bf16.mxu0 %vm1179_vm0, %v1178_v0  ;;  %v403_v2 = vld [vmem:[%s325_s17] sm:$0xff]  ;;  %v464_v4 = vld [vmem:[%s334_s22] sm:$0xf]  ;;  %vm459_vm2 = vcmask 7168   ;;  %v1180_v11 = vmov -inf   ;;  %vm508_vm3 = vcmask 64512  }
  0x75   : > { %824 = vmatprep.subr.bf16.mxu1 %v1178_v0  ;;  %826 = vmatprep.mubr.msk.bf16.mxu1 %vm1179_vm0, %v1178_v0  ;;  %v404_v3 = vpack.c.bf16 %v403_v2, %v403_v2  ;;  %460 = vst.msk [vmem:[#allocation3] sm:$0xff] %vm459_vm2, %v1180_v11  ;;  %461 = vst.msk [vmem:[#allocation4] sm:$0xff] %vm459_vm2, %v1178_v0  ;;  %v465_v12 = vld [vmem:[%s352_s25] sm:$0xf]  ;;  %v1181_v20 = vmov 0   ;;  %vm539_vm5 = vcmask 1043456  }
  0x76   : > { %819 = vmatpush3.bf16.msra.mxu0 %v932_v1  ;;  %825 = vmatpush3.bf16.xpose.msra.mxu1 %v464_v4  ;;  %v466_v13 = vunpack.c.l.bf16 %v465_v12  ;;  %v535_v26 = vld [vmem:[%s343_s7] sm:$0xf]  ;;  %s809_s24 = sshll.u32 %s1161_s21, 7  ;;  %s397_s26 = scalar_lea.vmem [#allocation14], %s799_s16 }
  0x77   : > { %830 = vmatprep.subr.bf16.mxu0 %v1178_v0  ;;  %930 = vset.pattern.permute.xlu0 %v1181_v20  ;;  %v541_v27 = vsel %vm539_vm5, %v535_v26, 0  ;;  %s623_s29 = sshll.u32 %s397_s26, 4  ;;  %s621_s12 = scalar_lea.hbm %s1467_s5, %s809_s24  ;;  %s624_s29 = int_to_ptr.vmem [resolvable:$true] %s623_s29 }
  0x78   : > { %931 = vset.pattern.permute.xlu1 %v1181_v20  ;;  %s609_s1 = scalar_lea.sflag [#allocation7], %s1380_s15  ;;  %s1077_s8 = scalar_lea.vmem %s624_s29, 128 }
  0x79   : > { %821 = vmatmul.mubr.msk.bf16.vlgmr.msra.gmra.mxu0 %vm413_vm1, %v404_v3  ;;  %p1078_p1 = scmp.ne.s32.totalorder %s624_s29, %s1077_s8  ;;  %s1182_s9 = smov [#allocation14]  }
  0x7a   : > { %832 = vmatprep.mubr.msk.bf16.mxu0 %vm1179_vm0, %v1178_v0  ;;  %831 = vmatpush3.bf16.msra.mxu0 %v541_v27  ;;  %s1081_s21 = sshll.u32 %s1182_s9, 4  ;;  %s1082_s21 = int_to_ptr.vmem [resolvable:$false] %s1081_s21 }
  0x7b   : > { %p1079_p4 = pnand %p1078_p1, %p1292_p0  ;;  %s1083_s4 = scalar_lea.vmem %s1082_s21, 256 }
  0x7c   : > { %v507_v21 = vld [vmem:[#allocation3] sm:$0xff]  ;;  %v526_v36 = vld [vmem:[#allocation4] sm:$0xff]  ;;  %p1084_p11 = scmp.lt.s32.totalorder %s624_s29, %s1082_s21  ;;  %p1085_p7 = scmp.lt.s32.totalorder %s1083_s4, %s1077_s8 }
  0x7d   : > { %p1080_p8 = pneg %p1079_p4 }
  0x7e   : > { %p1086_p2 = por %p1085_p7, %p1084_p11 }
  0x80   : > { %p1087_p6 = pnand %p1086_p2, %p1080_p8 }
 0x139   : > { %v451_v5 = vpop.f32.mrf.mxu0 }
 0x13a   : > { %v457_v6 = vpack.c.bf16 %v451_v5, %v451_v5 }
 0x13b   : > { %v822_v7 = vpop.f32.mrf.mxu0 }
 0x13c   : > { %458 = vst [vmem:[#allocation2] sm:$0xf] %v457_v6 }
 0x13d   : > { %v454_v8 = vpop.f32.mrf.mxu0 }
 0x13f   : > { %v823_v9 = vpop.f32.mrf.mxu0 }
 0x143   : > { %v463_v10 = vld [vmem:[#allocation2] sm:$0xf] }
 0x144   : > { %827 = vmatmul.mubr.bf16.vlgmr.msra.gmra.mxu1 %v463_v10 }
 0x204   : > { %v501_v14 = vpop.f32.mrf.mxu1 }
 0x205   : > { %v502_v15 = vadd.f32 %v501_v14, %v466_v13 }
 0x206   : > { %v828_v16 = vpop.f32.mrf.mxu1 }
 0x207   : > { %v509_v17 = vsel %vm508_vm3, %v502_v15, -inf }
 0x208   : > { %510 = vmax.xlane.f32.xlu0 %v509_v17  ;;  %v504_v18 = vpop.f32.mrf.mxu1 }
 0x20a   : > { %v829_v19 = vpop.f32.mrf.mxu1 }
 0x291   : > { %v511_v22 = vpop.xlane.xlu0 %510 }
 0x292   : > { %v512_v23 = vmax.f32 %v507_v21, %v511_v22 }
 0x294   : > { %592 = vst.msk [vmem:[#allocation3] sm:$0xff] %vm459_vm2, %v512_v23  ;;  %vm513_vm4 = vcmp.eq.f32.partialorder %v512_v23, -inf }
 0x295   : > { %v514_v24 = vsel %vm513_vm4, 0.0, %v512_v23 }
 0x296   : > { %520 = vperm.xlu0 %930, %v514_v24   ;;  %v515_v25 = vsub.f32 %v507_v21, %v514_v24 }
 0x298   : > { %v516_v32 = vmul.f32 1.442695, %v515_v25 }
 0x311   : > { %v521_v28 = vpop.permute.xlu0 %520 }
 0x312   : > { %v523_v29 = vsub.f32 %v502_v15, %v521_v28 }
 0x314   : > { %v524_v30 = vmul.f32 1.442695, %v523_v29 }
 0x316   : > { %933 = vpow2.f32 %v524_v30 }
 0x317   : > { %935 = vpow2.f32 %v516_v32 }
 0x323   : > { %v934_v31 = vpop.eup %933 }
 0x324   : > { %v528_v33 = vsel %vm508_vm3, %v934_v31, 0.0  ;;  %v534_v34 = vpack.c.bf16 %v934_v31, %v934_v31  ;;  %v936_v35 = vpop.eup %935 }
 0x325   : > { %529 = vadd.xlane.f32.xlu1 %v528_v33  ;;  %v527_v37 = vmul.f32 %v936_v35, %v526_v36 }
 0x326   : > { %833 = vmatmul.mubr.msk.bf16.vlgmr.msra.gmra.mxu0 %vm508_vm3, %v534_v34 }
 0x336   : > { %586 = vperm.xlu1 %931, %v936_v35  }
 0x3ae   : > { %v530_v38 = vpop.xlane.xlu1 %529 }
 0x3af   : > { %v531_v39 = vadd.f32 %v530_v38, %v527_v37 }
 0x3b1   : > { %533 = vst.msk [vmem:[#allocation4] sm:$0xff] %vm459_vm2, %v531_v39 }
 0x3b2   : > { %v587_v47 = vpop.permute.xlu1 %586 }
 0x3b3   : > { %v589_v48 = vmul.f32 0.0, %v587_v47 }
 0x3b8   : > { %v596_v40 = vld [vmem:[#allocation4] sm:$0xff] }
 0x3b9   : > { %vm597_vm6 = vcmp.eq.f32.partialorder %v596_v40, 0.0 }
 0x3ba   : > { %v598_v41 = vsel %vm597_vm6, 1.0, %v596_v40 }
 0x3bb   : > { %937 = vrcp.f32 %v598_v41 }
 0x3c8   : > { %v938_v42 = vpop.eup %937 }
 0x3c9   : > { %603 = vperm.xlu1 %931, %v938_v42  }
 0x3e6   : > { %v577_v43 = vpop.f32.mrf.mxu0 }
 0x3e7   : > { %v590_v49 = vadd.f32 %v589_v48, %v577_v43 }
 0x3e8   : > { %v834_v44 = vpop.f32.mrf.mxu0 }
 0x3ea   : > { %v580_v45 = vpop.f32.mrf.mxu0 }
 0x3ec   : > { %v835_v46 = vpop.f32.mrf.mxu0 }
 0x444   : > { %v604_v50 = vpop.permute.xlu1 %603 }
 0x445   : > { %v606_v51 = vmul.f32 %v604_v50, %v590_v49 }
 0x447   : > { %607 = vst [vmem:[%s397_s26] sm:$0xff] %v606_v51 }
 0x448   : > { %1090 = shalt.err (!%p1087_p6)
}
 0x449   : > { %s1091_s20 = scalar_lea.hbm %s621_s12, 128  ;;  %s1095_s16 = scalar_lea.hbm %s1467_s5, 256 }
 0x44a   : > { %p1092_p9 = scmp.ne.s32.totalorder %s621_s12, %s1091_s20  ;;  %p1096_p3 = scmp.lt.s32.totalorder %s621_s12, %s1467_s5 }
 0x44b   : > { %p1097_p5 = scmp.lt.s32.totalorder %s1095_s16, %s1091_s20 }
 0x44c   : > { %p1093_p12 = pnand %p1092_p9, %p1292_p0 }
 0x44d   : > { %p1098_p1 = por %p1097_p5, %p1096_p3 }
 0x44e   : > { %p1094_p13 = pneg %p1093_p12 }
 0x450   : > { %p1099_p4 = pnand %p1098_p1, %p1094_p13 }
 0x452   : > { %1102 = shalt.err (!%p1099_p4)
}
 0x453   : > { %848 = dma.vmem_to_hbm [thread:$0]  (%p1292_p0), %s624_s29, 128, %s621_s12, %s609_s1  }
 0x454 PF: > { %s1492_s28 = sld [smem:[#allocation20_spill]] }
 0x455   : > { %s1493_s6 = sld [smem:[#allocation23_spill]] }
 0x45a   : > { %s635_s11 = sand.u32 1, %s1492_s28  }
 0x45b   : > { %p1494_p8 = scmp.ne.s32.totalorder %s1493_s6, 0  ;;  %s636_s22 = scalar_lea.sflag [#allocation7], %s635_s11 }
 0x45d   : > { %p868_p11 = pnand %p789_p10, %p1494_p8 }
 0x45f   : > { %p869_p7 = pneg %p868_p11 }
 0x461   : > { %1144 = dma.done.wait (%p869_p7), %s636_s22, 128  }
 0x462   : > { %1146 = vsyncadd (%p869_p7), %s636_s22, 4294967168  ;;  %s27_s23 = sadd.s32 1, %s1169_s23   ;;  %s1495_s7 = sld [smem:[#allocation21_spill]] }
 0x463   : > { %p24_p2 = scmp.ge.s32.totalorder %s27_s23, 4   ;;  %s1496_s20 = sld [smem:[#allocation25_spill]] }
 0x464   : > { %s1497_s21 = sld [smem:[#allocation22_spill]]  ;;  %s1499_s18 = smov %s1153_s19 }
 0x465   : > { %s1498_s22 = sld [smem:[#allocation24_spill]]  ;;  %26 = sbr.rel (!%p24_p2) target bundleno = 13 (0xd), region = 134 }
 0x468   : > { %s1500_s19 = smov %s1495_s7 }
 0x46a   :  { %641 = vsyncpa [#allocation6], 1 }
 0x46b   :  { %643 = vsyncpa [#allocation6 + $0x1], 1 }
 0x46c   :  { %644 = vsyncpa [#allocation9], 1 }
 0x46d   :  { %646 = vsyncpa [#allocation9 + $0x1], 1 }
 0x46e   :  { %647 = vsyncpa [#allocation12], 1 }
 0x46f   :  { %649 = vsyncpa [#allocation12 + $0x1], 1 }
 0x470   :  { %650 = vsyncpa [#allocation7], 1 }
 0x471   :  { %652 = vsyncpa [#allocation7 + $0x1], 1 }

</bundles_post_ra>
